<compile_context>
chip_gen: v7x
topology: tpu7x:2x2x1
jax: 0.10.0
libtpu: 0.0.40
codegen_flags: <defaults>
</compile_context>

<pallas_src>
import math

import jax
import jax.numpy as jnp
from jax.experimental import pallas as pl
from jax.experimental.pallas import tpu as pltpu

EPS = 1e-5            # BatchNorm2d default eps
NEG_SLOPE = 0.01      # nn.LeakyReLU default negative_slope
ROW0 = 8              # first interior row inside the padded scratch (sublane-aligned)


def _round_up(x, m):
    return (x + m - 1) // m * m


def _lane_pad_channels(c, w):
    """Smallest c' >= c such that the packed (w, c') lane axis is a multiple of 128."""
    step = 128 // math.gcd(w, 128)
    return _round_up(c, step)


def _banded_weights(w_oihw, cin_pad, W):
    """Fold the horizontal (dx) conv taps into per-dy banded matrices.

    Returns (3, W*cin_pad, W*Cout) with
      mat[dy, w_in*cin_pad + ci, w_out*Cout + co] = w[co, ci, dy, dx],  w_in = w_out - 1 + dx
    and zero outside the band (this also implements the padding=1 boundary along W),
    so the kernel only shifts along H and does plain lane-dense matmuls.
    """
    Cout, Cin, KH, KW = w_oihw.shape
    assert KH == 3 and KW == 3
    k = jnp.transpose(w_oihw, (2, 3, 1, 0)).astype(jnp.float32)     # k[dy, dx, ci, co]
    if cin_pad > Cin:
        k = jnp.pad(k, ((0, 0), (0, 0), (0, cin_pad - Cin), (0, 0)))
    mats = []
    for dy in range(3):
        m = jnp.zeros((W, cin_pad, W, Cout), jnp.float32)
        for dx in range(3):
            lo, hi = max(0, 1 - dx), min(W, W + 1 - dx)
            w_out = jnp.arange(lo, hi)
            w_in = w_out + (dx - 1)
            band = jnp.zeros((W, W), jnp.float32).at[w_in, w_out].set(1.0)
            m = m + jnp.einsum('io,cd->icod', band, k[dy, dx])
        mats.append(m.reshape(W * cin_pad, W * Cout))
    return jnp.stack(mats, axis=0)


def _conv_bn_lrelu(pad_ref, w_ref, gamma, beta, rf, rb, N, H, W, Cout):
    """3x3 conv (stride 1, pad 1, no bias) + BatchNorm (batch stats) + LeakyReLU.

    pad_ref : (N, HP, W*Cin) - interior rows at [ROW0, ROW0+H), zero halo rows at
              ROW0-1 / ROW0+H; horizontal padding is folded into the weights.
    w_ref   : (3, W*Cin, W*Cout) banded per-dy weights.
    rf/rb   : (W*Cout, Cout) / (Cout, W*Cout) 0/1 fold / broadcast matrices.
    returns : (N*H, W*Cout) float32, lane-dense.
    """
    M = N * H
    wc_in = pad_ref.shape[-1]
    count = N * H * W

    # Three dy row slices (only two are one sublane off) -> three lane-dense MXU
    # matmuls; no zero-init accumulator, no concat, no big reshape.
    acc = None
    for dy in range(3):
        tap = pad_ref[:, ROW0 - 1 + dy:ROW0 - 1 + dy + H, :].reshape(M, wc_in)
        part = jnp.dot(tap, w_ref[dy], preferred_element_type=jnp.float32)
        acc = part if acc is None else acc + part

    # BatchNorm2d, training mode: per-channel stats over N, H, W.  The packed
    # (w, c) lane axis is folded down to channels with a tiny constant matmul
    # (MXU is idle here) and scale/shift are broadcast back to full-width lanes.
    # TODO(synk): with an M-tiled grid these become per-tile partial sums
    # accumulated in scratch (two-pass BN), finalized under pl.when on the last step.
    s_lane = jnp.sum(acc, axis=0, keepdims=True)             # (1, W*Cout)
    ss_lane = jnp.sum(acc * acc, axis=0, keepdims=True)      # (1, W*Cout)
    stats = jnp.dot(jnp.concatenate([s_lane, ss_lane], axis=0), rf,
                    preferred_element_type=jnp.float32)       # (2, Cout)
    mean = stats[0:1, :] * (1.0 / count)
    var = jnp.maximum(stats[1:2, :] * (1.0 / count) - mean * mean, 0.0)
    scale_c = gamma * jax.lax.rsqrt(var + EPS)                # (1, Cout)
    shift_c = beta - mean * scale_c
    sl = jnp.dot(jnp.concatenate([scale_c, shift_c], axis=0), rb,
                 preferred_element_type=jnp.float32)          # (2, W*Cout) full-width
    y = acc * sl[0:1, :] + sl[1:2, :]
    return jnp.where(y >= 0, y, NEG_SLOPE * y)                # LeakyReLU


def fused_cnn_layer_kernel(x_ref, w1_ref, g1_ref, b1_ref, w2_ref, g2_ref, b2_ref,
                           rf_ref, rb_ref, out_ref, pad1_ref, pad2_ref):
    N, H, _ = x_ref.shape
    wc_out, Cout = rf_ref.shape
    W = wc_out // Cout

    # Halo-only zeroing: the only scratch rows that are read but never written are
    # ROW0-1 and ROW0+H; the interior is overwritten below, other rows are unused.
    for pad_ref in (pad1_ref, pad2_ref):
        z = jnp.zeros((N, 1, pad_ref.shape[-1]), pad_ref.dtype)
        pad_ref[:, ROW0 - 1:ROW0, :] = z
        pad_ref[:, ROW0 + H:ROW0 + H + 1, :] = z

    # ---- block 1: aligned, lane-dense interior store ----
    pad1_ref[:, ROW0:ROW0 + H, :] = x_ref[...]
    y1 = _conv_bn_lrelu(pad1_ref, w1_ref, g1_ref[...], b1_ref[...],
                        rf_ref[...], rb_ref[...], N, H, W, Cout)

    # ---- block 2: intermediate activation never leaves VMEM ----
    pad2_ref[:, ROW0:ROW0 + H, :] = y1.reshape(N, H, wc_out)
    y2 = _conv_bn_lrelu(pad2_ref, w2_ref, g2_ref[...], b2_ref[...],
                        rf_ref[...], rb_ref[...], N, H, W, Cout)

    out_ref[...] = y2                      # (N*H, W*Cout): unmasked lane-dense stores


def cnn_layer(x_nchw, params):
    """Forward pass of CNNLayer. Input/output NCHW, like the PyTorch module."""
    w1, g1, b1, w2, g2, b2 = params
    N, Cin, H, W = x_nchw.shape
    Cout = w1.shape[0]

    cin_pad = _lane_pad_channels(Cin, W)           # 4 -> 8 so W*Cin lanes = 128
    HP = ROW0 + _round_up(H + 1, 8)

    # NCHW -> (N, H, W*Cin_pad): channels packed into the lane axis with w.
    x = jnp.transpose(x_nchw, (0, 2, 3, 1))
    x = jnp.pad(x, ((0, 0), (0, 0), (0, 0), (0, cin_pad - Cin)))
    x = x.reshape(N, H, W * cin_pad)

    w1m = _banded_weights(w1, cin_pad, W)          # (3, W*cin_pad, W*Cout)
    w2m = _banded_weights(w2, Cout, W)             # (3, W*Cout,    W*Cout)

    # 0/1 fold / broadcast matrices between the packed (w, c) lane axis and channels.
    rf = jnp.tile(jnp.eye(Cout, dtype=jnp.float32), (W, 1))   # (W*Cout, Cout)
    rb = rf.T                                                  # (Cout, W*Cout)

    # Explicit VMEM budget derived from the actual footprint (generous headroom),
    # capped at 32 MiB so it stays within every generation's scoped limit.
    elems = (x.size + w1m.size + w2m.size + rf.size + rb.size + 4 * Cout
             + N * HP * (W * cin_pad + W * Cout)               # pad scratch
             + 3 * N * H * W * Cout)                           # output + acc temporaries
    vmem_limit = int(min(32 * 1024 * 1024, 4 * 4 * elems + (16 << 20)))

    out = pl.pallas_call(
        fused_cnn_layer_kernel,
        out_shape=jax.ShapeDtypeStruct((N * H, W * Cout), jnp.float32),
        in_specs=[pl.BlockSpec(memory_space=pltpu.MemorySpace.VMEM)] * 9,
        out_specs=pl.BlockSpec(memory_space=pltpu.MemorySpace.VMEM),
        scratch_shapes=[pltpu.VMEM((N, HP, W * cin_pad), jnp.float32),
                        pltpu.VMEM((N, HP, W * Cout), jnp.float32)],
        compiler_params=pltpu.CompilerParams(vmem_limit_bytes=vmem_limit),
    )(x, w1m, g1.reshape(1, Cout), b1.reshape(1, Cout),
      w2m, g2.reshape(1, Cout), b2.reshape(1, Cout), rf, rb)

    # TODO(synk): BatchNorm running_mean/running_var buffer updates (training-time
    #   side effect) are not materialized; they do not affect the forward output.
    # TODO(synk): for non-toy shapes add an M-tiled grid over row blocks with
    #   dimension_semantics=("parallel", ..., "arbitrary") (v7x megacore / DMA
    #   overlap) and two-pass BN (per-tile sum/sum-sq in scratch, finalize+apply
    #   under pl.when); at this size a grid only adds per-step overhead because the
    #   BN statistics are global anyway.
    # TODO(synk): at realistic channel counts cast the matmul operands to bfloat16
    #   (keep f32 accumulation / BN math) for the v6e/v7x MXU; skipped here to keep
    #   the 1e-3 parity check tight while the MXU is <1% utilized.
    out = out.reshape(N, H, W, Cout)
    return jnp.transpose(out, (0, 3, 1, 2))


def reference(x_nchw, params):
    """Pure-JAX reference (lax conv) for verification."""
    w1, g1, b1, w2, g2, b2 = params

    def block(x, w, g, b):
        y = jax.lax.conv_general_dilated(
            x, w, (1, 1), 'SAME',
            dimension_numbers=('NCHW', 'OIHW', 'NCHW'))
        m = y.mean(axis=(0, 2, 3), keepdims=True)
        v = ((y - m) ** 2).mean(axis=(0, 2, 3), keepdims=True)
        y = (y - m) * jax.lax.rsqrt(v + EPS)
        y = y * g.reshape(1, -1, 1, 1) + b.reshape(1, -1, 1, 1)
        return jnp.where(y >= 0, y, NEG_SLOPE * y)

    return block(block(x_nchw, w1, g1, b1), w2, g2, b2)


if __name__ == "__main__":
    # Small, deterministic problem: CNNLayer(in_channels=4, out_channels=8)
    N, Cin, Cout, H, W = 2, 4, 8, 16, 16
    key = jax.random.PRNGKey(0)
    kx, kw1, kw2 = jax.random.split(key, 3)

    x = jax.random.normal(kx, (N, Cin, H, W), dtype=jnp.float32)
    # Conv weights in PyTorch OIHW convention, deterministic init.
    w1 = 0.1 * jax.random.normal(kw1, (Cout, Cin, 3, 3), dtype=jnp.float32)
    w2 = 0.1 * jax.random.normal(kw2, (Cout, Cout, 3, 3), dtype=jnp.float32)
    # BatchNorm2d default init: weight=1, bias=0.
    g1 = jnp.ones((Cout,), jnp.float32)
    b1 = jnp.zeros((Cout,), jnp.float32)
    g2 = jnp.ones((Cout,), jnp.float32)
    b2 = jnp.zeros((Cout,), jnp.float32)
    params = (w1, g1, b1, w2, g2, b2)

    out = jax.block_until_ready(cnn_layer(x, params))
    ref = jax.block_until_ready(reference(x, params))

    assert out.shape == (N, Cout, H, W), out.shape
    assert jnp.allclose(out, ref, rtol=1e-3, atol=1e-3), (
        float(jnp.max(jnp.abs(out - ref))))

    print("KERNEL_OK")
</pallas_src>

<mosaic_0001>
module attributes {stable_mosaic.version = 11 : i64} {
  func.func @fused_cnn_layer_kernel(%arg0: memref<2x16x128xf32, #tpu.memory_space<vmem>>, %arg1: memref<3x128x128xf32, #tpu.memory_space<vmem>>, %arg2: memref<1x8xf32, #tpu.memory_space<vmem>>, %arg3: memref<1x8xf32, #tpu.memory_space<vmem>>, %arg4: memref<3x128x128xf32, #tpu.memory_space<vmem>>, %arg5: memref<1x8xf32, #tpu.memory_space<vmem>>, %arg6: memref<1x8xf32, #tpu.memory_space<vmem>>, %arg7: memref<128x8xf32, #tpu.memory_space<vmem>>, %arg8: memref<8x128xf32, #tpu.memory_space<vmem>>, %arg9: memref<32x128xf32, #tpu.memory_space<vmem>>, %arg10: memref<2x32x128xf32, #tpu.memory_space<vmem>>, %arg11: memref<2x32x128xf32, #tpu.memory_space<vmem>>) attributes {dimension_semantics = [], scalar_prefetch = 0 : i64, scratch_operands = 2 : i64, tpu.core_type = #tpu.core_type<tc>} {
    %cst = arith.constant 0.000000e+00 : f32
    %0 = vector.broadcast %cst : f32 to vector<2x1x128xf32>
    %c0 = arith.constant 0 : index
    %c7 = arith.constant 7 : index
    %c0_0 = arith.constant 0 : index
    %1 = vector.load %arg10[%c0, %c7, %c0_0] : memref<2x32x128xf32, #tpu.memory_space<vmem>>, vector<2x1x128xf32>
    tpu.vector_store %arg10[%c0, %c7, %c0_0], %0 {strides = array<i32>} : memref<2x32x128xf32, #tpu.memory_space<vmem>>, vector<2x1x128xf32>,
    %c0_1 = arith.constant 0 : index
    %c24 = arith.constant 24 : index
    %c0_2 = arith.constant 0 : index
    %2 = vector.load %arg10[%c0_1, %c24, %c0_2] : memref<2x32x128xf32, #tpu.memory_space<vmem>>, vector<2x1x128xf32>
    tpu.vector_store %arg10[%c0_1, %c24, %c0_2], %0 {strides = array<i32>} : memref<2x32x128xf32, #tpu.memory_space<vmem>>, vector<2x1x128xf32>,
    %cst_3 = arith.constant 0.000000e+00 : f32
    %3 = vector.broadcast %cst_3 : f32 to vector<2x1x128xf32>
    %c0_4 = arith.constant 0 : index
    %c7_5 = arith.constant 7 : index
    %c0_6 = arith.constant 0 : index
    %4 = vector.load %arg11[%c0_4, %c7_5, %c0_6] : memref<2x32x128xf32, #tpu.memory_space<vmem>>, vector<2x1x128xf32>
    tpu.vector_store %arg11[%c0_4, %c7_5, %c0_6], %3 {strides = array<i32>} : memref<2x32x128xf32, #tpu.memory_space<vmem>>, vector<2x1x128xf32>,
    %c0_7 = arith.constant 0 : index
    %c24_8 = arith.constant 24 : index
    %c0_9 = arith.constant 0 : index
    %5 = vector.load %arg11[%c0_7, %c24_8, %c0_9] : memref<2x32x128xf32, #tpu.memory_space<vmem>>, vector<2x1x128xf32>
    tpu.vector_store %arg11[%c0_7, %c24_8, %c0_9], %3 {strides = array<i32>} : memref<2x32x128xf32, #tpu.memory_space<vmem>>, vector<2x1x128xf32>,
    %c0_10 = arith.constant 0 : index
    %c0_11 = arith.constant 0 : index
    %c0_12 = arith.constant 0 : index
    %6 = vector.load %arg0[%c0_10, %c0_11, %c0_12] : memref<2x16x128xf32, #tpu.memory_space<vmem>>, vector<2x16x128xf32>
    %c0_13 = arith.constant 0 : index
    %c8 = arith.constant 8 : index
    %c0_14 = arith.constant 0 : index
    %7 = vector.load %arg10[%c0_13, %c8, %c0_14] : memref<2x32x128xf32, #tpu.memory_space<vmem>>, vector<2x16x128xf32>
    tpu.vector_store %arg10[%c0_13, %c8, %c0_14], %6 {strides = array<i32>} : memref<2x32x128xf32, #tpu.memory_space<vmem>>, vector<2x16x128xf32>,
    %c0_15 = arith.constant 0 : index
    %c0_16 = arith.constant 0 : index
    %8 = vector.load %arg2[%c0_15, %c0_16] : memref<1x8xf32, #tpu.memory_space<vmem>>, vector<1x8xf32>
    %c0_17 = arith.constant 0 : index
    %c0_18 = arith.constant 0 : index
    %9 = vector.load %arg3[%c0_17, %c0_18] : memref<1x8xf32, #tpu.memory_space<vmem>>, vector<1x8xf32>
    %c0_19 = arith.constant 0 : index
    %c0_20 = arith.constant 0 : index
    %10 = vector.load %arg7[%c0_19, %c0_20] : memref<128x8xf32, #tpu.memory_space<vmem>>, vector<128x8xf32>
    %c0_21 = arith.constant 0 : index
    %c0_22 = arith.constant 0 : index
    %11 = vector.load %arg8[%c0_21, %c0_22] : memref<8x128xf32, #tpu.memory_space<vmem>>, vector<8x128xf32>
    %c0_23 = arith.constant 0 : index
    %c7_24 = arith.constant 7 : index
    %c0_25 = arith.constant 0 : index
    %12 = vector.load %arg10[%c0_23, %c7_24, %c0_25] : memref<2x32x128xf32, #tpu.memory_space<vmem>>, vector<2x16x128xf32>
    %13 = vector.shape_cast %12 : vector<2x16x128xf32> to vector<32x128xf32>
    %c0_26 = arith.constant 0 : index
    %c0_27 = arith.constant 0 : index
    %c0_28 = arith.constant 0 : index
    %14 = vector.load %arg1[%c0_26, %c0_27, %c0_28] : memref<3x128x128xf32, #tpu.memory_space<vmem>>, vector<1x128x128xf32>
    %15 = vector.shape_cast %14 : vector<1x128x128xf32> to vector<128x128xf32>
    %cst_29 = arith.constant dense<0.000000e+00> : vector<32x128xf32>
    %16 = tpu.matmul %13, %15, %cst_29 {dimension_numbers = #tpu.dot_dimension_numbers<[1], [0], [0], [1], [0, 0, 1, 1], [], []>} : vector<32x128xf32>, vector<128x128xf32>, vector<32x128xf32> -> vector<32x128xf32>
    %c0_30 = arith.constant 0 : index
    %c8_31 = arith.constant 8 : index
    %c0_32 = arith.constant 0 : index
    %17 = vector.load %arg10[%c0_30, %c8_31, %c0_32] : memref<2x32x128xf32, #tpu.memory_space<vmem>>, vector<2x16x128xf32>
    %18 = vector.shape_cast %17 : vector<2x16x128xf32> to vector<32x128xf32>
    %c1 = arith.constant 1 : index
    %c0_33 = arith.constant 0 : index
    %c0_34 = arith.constant 0 : index
    %19 = vector.load %arg1[%c1, %c0_33, %c0_34] : memref<3x128x128xf32, #tpu.memory_space<vmem>>, vector<1x128x128xf32>
    %20 = vector.shape_cast %19 : vector<1x128x128xf32> to vector<128x128xf32>
    %cst_35 = arith.constant dense<0.000000e+00> : vector<32x128xf32>
    %21 = tpu.matmul %18, %20, %cst_35 {dimension_numbers = #tpu.dot_dimension_numbers<[1], [0], [0], [1], [0, 0, 1, 1], [], []>} : vector<32x128xf32>, vector<128x128xf32>, vector<32x128xf32> -> vector<32x128xf32>
    %22 = arith.addf %16, %21 : vector<32x128xf32>
    %c0_36 = arith.constant 0 : index
    %c9 = arith.constant 9 : index
    %c0_37 = arith.constant 0 : index
    %23 = vector.load %arg10[%c0_36, %c9, %c0_37] : memref<2x32x128xf32, #tpu.memory_space<vmem>>, vector<2x16x128xf32>
    %24 = vector.shape_cast %23 : vector<2x16x128xf32> to vector<32x128xf32>
    %c2 = arith.constant 2 : index
    %c0_38 = arith.constant 0 : index
    %c0_39 = arith.constant 0 : index
    %25 = vector.load %arg1[%c2, %c0_38, %c0_39] : memref<3x128x128xf32, #tpu.memory_space<vmem>>, vector<1x128x128xf32>
    %26 = vector.shape_cast %25 : vector<1x128x128xf32> to vector<128x128xf32>
    %cst_40 = arith.constant dense<0.000000e+00> : vector<32x128xf32>
    %27 = tpu.matmul %24, %26, %cst_40 {dimension_numbers = #tpu.dot_dimension_numbers<[1], [0], [0], [1], [0, 0, 1, 1], [], []>} : vector<32x128xf32>, vector<128x128xf32>, vector<32x128xf32> -> vector<32x128xf32>
    %28 = arith.addf %22, %27 : vector<32x128xf32>
    %cst_41 = arith.constant dense<0.000000e+00> : vector<128xf32>
    %29 = vector.multi_reduction <add>, %28, %cst_41 [0] : vector<32x128xf32> to vector<128xf32>
    %30 = vector.shape_cast %29 : vector<128xf32> to vector<1x128xf32>
    %31 = arith.mulf %28, %28 : vector<32x128xf32>
    %cst_42 = arith.constant dense<0.000000e+00> : vector<128xf32>
    %32 = vector.multi_reduction <add>, %31, %cst_42 [0] : vector<32x128xf32> to vector<128xf32>
    %33 = vector.shape_cast %32 : vector<128xf32> to vector<1x128xf32>
    %34 = tpu.concatenate %30, %33 in 0 : vector<1x128xf32>, vector<1x128xf32> -> vector<2x128xf32>
    %cst_43 = arith.constant dense<0.000000e+00> : vector<2x8xf32>
    %35 = tpu.matmul %34, %10, %cst_43 {dimension_numbers = #tpu.dot_dimension_numbers<[1], [0], [0], [1], [0, 0, 1, 1], [], []>} : vector<2x128xf32>, vector<128x8xf32>, vector<2x8xf32> -> vector<2x8xf32>
    %36 = vector.extract_strided_slice %35 {offsets = [0, 0], sizes = [1, 8], strides = [1, 1]} : vector<2x8xf32> to vector<1x8xf32>
    %cst_44 = arith.constant 0.001953125 : f32
    %37 = vector.broadcast %cst_44 : f32 to vector<1x8xf32>
    %38 = arith.mulf %36, %37 : vector<1x8xf32>
    %39 = vector.extract_strided_slice %35 {offsets = [1, 0], sizes = [1, 8], strides = [1, 1]} : vector<2x8xf32> to vector<1x8xf32>
    %cst_45 = arith.constant 0.001953125 : f32
    %40 = vector.broadcast %cst_45 : f32 to vector<1x8xf32>
    %41 = arith.mulf %39, %40 : vector<1x8xf32>
    %42 = arith.mulf %38, %38 : vector<1x8xf32>
    %43 = arith.subf %41, %42 : vector<1x8xf32>
    %cst_46 = arith.constant 0.000000e+00 : f32
    %44 = vector.broadcast %cst_46 : f32 to vector<1x8xf32>
    %45 = arith.maximumf %43, %44 : vector<1x8xf32>
    %cst_47 = arith.constant 9.99999974E-6 : f32
    %46 = vector.broadcast %cst_47 : f32 to vector<1x8xf32>
    %47 = arith.addf %45, %46 : vector<1x8xf32>
    %48 = math.rsqrt %47 : vector<1x8xf32>
    %49 = arith.mulf %8, %48 : vector<1x8xf32>
    %50 = arith.mulf %38, %49 : vector<1x8xf32>
    %51 = arith.subf %9, %50 : vector<1x8xf32>
    %52 = tpu.concatenate %49, %51 in 0 : vector<1x8xf32>, vector<1x8xf32> -> vector<2x8xf32>
    %cst_48 = arith.constant dense<0.000000e+00> : vector<2x128xf32>
    %53 = tpu.matmul %52, %11, %cst_48 {dimension_numbers = #tpu.dot_dimension_numbers<[1], [0], [0], [1], [0, 0, 1, 1], [], []>} : vector<2x8xf32>, vector<8x128xf32>, vector<2x128xf32> -> vector<2x128xf32>
    %54 = vector.extract_strided_slice %53 {offsets = [0, 0], sizes = [1, 128], strides = [1, 1]} : vector<2x128xf32> to vector<1x128xf32>
    %55 = vector.broadcast %54 : vector<1x128xf32> to vector<32x128xf32>
    %56 = arith.mulf %28, %55 : vector<32x128xf32>
    %57 = vector.extract_strided_slice %53 {offsets = [1, 0], sizes = [1, 128], strides = [1, 1]} : vector<2x128xf32> to vector<1x128xf32>
    %58 = vector.broadcast %57 : vector<1x128xf32> to vector<32x128xf32>
    %59 = arith.addf %56, %58 : vector<32x128xf32>
    %cst_49 = arith.constant 0.000000e+00 : f32
    %60 = vector.broadcast %cst_49 : f32 to vector<32x128xf32>
    %61 = arith.cmpf oge, %59, %60 : vector<32x128xf32>
    %cst_50 = arith.constant 0.00999999977 : f32
    %62 = vector.broadcast %cst_50 : f32 to vector<32x128xf32>
    %63 = arith.mulf %62, %59 : vector<32x128xf32>
    %64 = arith.select %61, %59, %63 : vector<32x128xi1>, vector<32x128xf32>
    %65 = vector.shape_cast %64 : vector<32x128xf32> to vector<2x16x128xf32>
    %c0_51 = arith.constant 0 : index
    %c8_52 = arith.constant 8 : index
    %c0_53 = arith.constant 0 : index
    %66 = vector.load %arg11[%c0_51, %c8_52, %c0_53] : memref<2x32x128xf32, #tpu.memory_space<vmem>>, vector<2x16x128xf32>
    tpu.vector_store %arg11[%c0_51, %c8_52, %c0_53], %65 {strides = array<i32>} : memref<2x32x128xf32, #tpu.memory_space<vmem>>, vector<2x16x128xf32>,
    %c0_54 = arith.constant 0 : index
    %c0_55 = arith.constant 0 : index
    %67 = vector.load %arg5[%c0_54, %c0_55] : memref<1x8xf32, #tpu.memory_space<vmem>>, vector<1x8xf32>
    %c0_56 = arith.constant 0 : index
    %c0_57 = arith.constant 0 : index
    %68 = vector.load %arg6[%c0_56, %c0_57] : memref<1x8xf32, #tpu.memory_space<vmem>>, vector<1x8xf32>
    %c0_58 = arith.constant 0 : index
    %c0_59 = arith.constant 0 : index
    %69 = vector.load %arg7[%c0_58, %c0_59] : memref<128x8xf32, #tpu.memory_space<vmem>>, vector<128x8xf32>
    %c0_60 = arith.constant 0 : index
    %c0_61 = arith.constant 0 : index
    %70 = vector.load %arg8[%c0_60, %c0_61] : memref<8x128xf32, #tpu.memory_space<vmem>>, vector<8x128xf32>
    %c0_62 = arith.constant 0 : index
    %c7_63 = arith.constant 7 : index
    %c0_64 = arith.constant 0 : index
    %71 = vector.load %arg11[%c0_62, %c7_63, %c0_64] : memref<2x32x128xf32, #tpu.memory_space<vmem>>, vector<2x16x128xf32>
    %72 = vector.shape_cast %71 : vector<2x16x128xf32> to vector<32x128xf32>
    %c0_65 = arith.constant 0 : index
    %c0_66 = arith.constant 0 : index
    %c0_67 = arith.constant 0 : index
    %73 = vector.load %arg4[%c0_65, %c0_66, %c0_67] : memref<3x128x128xf32, #tpu.memory_space<vmem>>, vector<1x128x128xf32>
    %74 = vector.shape_cast %73 : vector<1x128x128xf32> to vector<128x128xf32>
    %cst_68 = arith.constant dense<0.000000e+00> : vector<32x128xf32>
    %75 = tpu.matmul %72, %74, %cst_68 {dimension_numbers = #tpu.dot_dimension_numbers<[1], [0], [0], [1], [0, 0, 1, 1], [], []>} : vector<32x128xf32>, vector<128x128xf32>, vector<32x128xf32> -> vector<32x128xf32>
    %c0_69 = arith.constant 0 : index
    %c8_70 = arith.constant 8 : index
    %c0_71 = arith.constant 0 : index
    %76 = vector.load %arg11[%c0_69, %c8_70, %c0_71] : memref<2x32x128xf32, #tpu.memory_space<vmem>>, vector<2x16x128xf32>
    %77 = vector.shape_cast %76 : vector<2x16x128xf32> to vector<32x128xf32>
    %c1_72 = arith.constant 1 : index
    %c0_73 = arith.constant 0 : index
    %c0_74 = arith.constant 0 : index
    %78 = vector.load %arg4[%c1_72, %c0_73, %c0_74] : memref<3x128x128xf32, #tpu.memory_space<vmem>>, vector<1x128x128xf32>
    %79 = vector.shape_cast %78 : vector<1x128x128xf32> to vector<128x128xf32>
    %cst_75 = arith.constant dense<0.000000e+00> : vector<32x128xf32>
    %80 = tpu.matmul %77, %79, %cst_75 {dimension_numbers = #tpu.dot_dimension_numbers<[1], [0], [0], [1], [0, 0, 1, 1], [], []>} : vector<32x128xf32>, vector<128x128xf32>, vector<32x128xf32> -> vector<32x128xf32>
    %81 = arith.addf %75, %80 : vector<32x128xf32>
    %c0_76 = arith.constant 0 : index
    %c9_77 = arith.constant 9 : index
    %c0_78 = arith.constant 0 : index
    %82 = vector.load %arg11[%c0_76, %c9_77, %c0_78] : memref<2x32x128xf32, #tpu.memory_space<vmem>>, vector<2x16x128xf32>
    %83 = vector.shape_cast %82 : vector<2x16x128xf32> to vector<32x128xf32>
    %c2_79 = arith.constant 2 : index
    %c0_80 = arith.constant 0 : index
    %c0_81 = arith.constant 0 : index
    %84 = vector.load %arg4[%c2_79, %c0_80, %c0_81] : memref<3x128x128xf32, #tpu.memory_space<vmem>>, vector<1x128x128xf32>
    %85 = vector.shape_cast %84 : vector<1x128x128xf32> to vector<128x128xf32>
    %cst_82 = arith.constant dense<0.000000e+00> : vector<32x128xf32>
    %86 = tpu.matmul %83, %85, %cst_82 {dimension_numbers = #tpu.dot_dimension_numbers<[1], [0], [0], [1], [0, 0, 1, 1], [], []>} : vector<32x128xf32>, vector<128x128xf32>, vector<32x128xf32> -> vector<32x128xf32>
    %87 = arith.addf %81, %86 : vector<32x128xf32>
    %cst_83 = arith.constant dense<0.000000e+00> : vector<128xf32>
    %88 = vector.multi_reduction <add>, %87, %cst_83 [0] : vector<32x128xf32> to vector<128xf32>
    %89 = vector.shape_cast %88 : vector<128xf32> to vector<1x128xf32>
    %90 = arith.mulf %87, %87 : vector<32x128xf32>
    %cst_84 = arith.constant dense<0.000000e+00> : vector<128xf32>
    %91 = vector.multi_reduction <add>, %90, %cst_84 [0] : vector<32x128xf32> to vector<128xf32>
    %92 = vector.shape_cast %91 : vector<128xf32> to vector<1x128xf32>
    %93 = tpu.concatenate %89, %92 in 0 : vector<1x128xf32>, vector<1x128xf32> -> vector<2x128xf32>
    %cst_85 = arith.constant dense<0.000000e+00> : vector<2x8xf32>
    %94 = tpu.matmul %93, %69, %cst_85 {dimension_numbers = #tpu.dot_dimension_numbers<[1], [0], [0], [1], [0, 0, 1, 1], [], []>} : vector<2x128xf32>, vector<128x8xf32>, vector<2x8xf32> -> vector<2x8xf32>
    %95 = vector.extract_strided_slice %94 {offsets = [0, 0], sizes = [1, 8], strides = [1, 1]} : vector<2x8xf32> to vector<1x8xf32>
    %cst_86 = arith.constant 0.001953125 : f32
    %96 = vector.broadcast %cst_86 : f32 to vector<1x8xf32>
    %97 = arith.mulf %95, %96 : vector<1x8xf32>
    %98 = vector.extract_strided_slice %94 {offsets = [1, 0], sizes = [1, 8], strides = [1, 1]} : vector<2x8xf32> to vector<1x8xf32>
    %cst_87 = arith.constant 0.001953125 : f32
    %99 = vector.broadcast %cst_87 : f32 to vector<1x8xf32>
    %100 = arith.mulf %98, %99 : vector<1x8xf32>
    %101 = arith.mulf %97, %97 : vector<1x8xf32>
    %102 = arith.subf %100, %101 : vector<1x8xf32>
    %cst_88 = arith.constant 0.000000e+00 : f32
    %103 = vector.broadcast %cst_88 : f32 to vector<1x8xf32>
    %104 = arith.maximumf %102, %103 : vector<1x8xf32>
    %cst_89 = arith.constant 9.99999974E-6 : f32
    %105 = vector.broadcast %cst_89 : f32 to vector<1x8xf32>
    %106 = arith.addf %104, %105 : vector<1x8xf32>
    %107 = math.rsqrt %106 : vector<1x8xf32>
    %108 = arith.mulf %67, %107 : vector<1x8xf32>
    %109 = arith.mulf %97, %108 : vector<1x8xf32>
    %110 = arith.subf %68, %109 : vector<1x8xf32>
    %111 = tpu.concatenate %108, %110 in 0 : vector<1x8xf32>, vector<1x8xf32> -> vector<2x8xf32>
    %cst_90 = arith.constant dense<0.000000e+00> : vector<2x128xf32>
    %112 = tpu.matmul %111, %70, %cst_90 {dimension_numbers = #tpu.dot_dimension_numbers<[1], [0], [0], [1], [0, 0, 1, 1], [], []>} : vector<2x8xf32>, vector<8x128xf32>, vector<2x128xf32> -> vector<2x128xf32>
    %113 = vector.extract_strided_slice %112 {offsets = [0, 0], sizes = [1, 128], strides = [1, 1]} : vector<2x128xf32> to vector<1x128xf32>
    %114 = vector.broadcast %113 : vector<1x128xf32> to vector<32x128xf32>
    %115 = arith.mulf %87, %114 : vector<32x128xf32>
    %116 = vector.extract_strided_slice %112 {offsets = [1, 0], sizes = [1, 128], strides = [1, 1]} : vector<2x128xf32> to vector<1x128xf32>
    %117 = vector.broadcast %116 : vector<1x128xf32> to vector<32x128xf32>
    %118 = arith.addf %115, %117 : vector<32x128xf32>
    %cst_91 = arith.constant 0.000000e+00 : f32
    %119 = vector.broadcast %cst_91 : f32 to vector<32x128xf32>
    %120 = arith.cmpf oge, %118, %119 : vector<32x128xf32>
    %cst_92 = arith.constant 0.00999999977 : f32
    %121 = vector.broadcast %cst_92 : f32 to vector<32x128xf32>
    %122 = arith.mulf %121, %118 : vector<32x128xf32>
    %123 = arith.select %120, %118, %122 : vector<32x128xi1>, vector<32x128xf32>
    %c0_93 = arith.constant 0 : index
    %c0_94 = arith.constant 0 : index
    %124 = vector.load %arg9[%c0_93, %c0_94] : memref<32x128xf32, #tpu.memory_space<vmem>>, vector<32x128xf32>
    tpu.vector_store %arg9[%c0_93, %c0_94], %123 {strides = array<i32>} : memref<32x128xf32, #tpu.memory_space<vmem>>, vector<32x128xf32>,
    return
  }
}

</mosaic_0001>

<bundles_post_ra>
// kernel: tpu_custom_call.1
= control target key start
LH: loop header
LB: loop body
LE: loop exit
PB: predicated region body
PF: predicated region fallthrough
CT: control target
= control target key end

     0   :  { %14 = vsyncpa [#allocation5], 0  ;;  %s2330_s0 = inlined_call_operand.vmem [shape: f32[2,16,128], index: 0, kind: input, shape index: {}]   ;;  %s2331_s1 = inlined_call_operand.hbm [shape: f32[3,128,128], index: 1, kind: input, shape index: {}]   ;;  %s2332_s2 = inlined_call_operand.vmem [shape: f32[1,8], index: 2, kind: input, shape index: {}]   ;;  %s2333_s3 = inlined_call_operand.vmem [shape: f32[1,8], index: 3, kind: input, shape index: {}]   ;;  %s2334_s4 = inlined_call_operand.hbm [shape: f32[3,128,128], index: 4, kind: input, shape index: {}]   ;;  %s2335_s5 = inlined_call_operand.vmem [shape: f32[1,8], index: 5, kind: input, shape index: {}]   ;;  %s2336_s6 = inlined_call_operand.vmem [shape: f32[1,8], index: 6, kind: input, shape index: {}]   ;;  %s2337_s7 = inlined_call_operand.vmem [shape: f32[128,8], index: 7, kind: input, shape index: {}]   ;;  %s2338_s8 = inlined_call_operand.vmem [shape: f32[8,128], index: 8, kind: input, shape index: {}]   ;;  %s2339_s9 = inlined_call_operand.hbm [shape: f32[32,128], index: 9, kind: output, shape index: {}]  }
   0x1   :  { %15 = vsyncpa [#allocation8], 0 }
   0x2   :  { %16 = vsyncpa [#allocation6], 0  ;;  %s2054_s30 = smov [#allocation4]   ;;  %s1982_s13 = scalar_lea.hbm %s2331_s1, 6144 }
   0x3   :  { %s24_s10 = sshll.u32 %s2054_s30, 4  ;;  %p1983_p0 = scmp.ne.s32.totalorder %s2331_s1, %s1982_s13  ;;  %s25_s10 = int_to_ptr.vmem [resolvable:$true] %s24_s10 }
   0x4   :  { %p1986_p1 = scmp.lt.u32.totalorder %s1982_s13, %s2331_s1 }
   0x6   :  { %p1988_p2 = pnand %p1986_p1, %p1983_p0 }
   0x8   :  { %1991 = shalt.err (!%p1988_p2)
}
   0x9   :  { %s1992_s18 = scalar_lea.vmem %s25_s10, 6144  ;;  %p1997_p4 = scmp.lt.s32.totalorder %s25_s10, %s25_s10 }
   0xa   :  { %p1993_p3 = scmp.ne.s32.totalorder %s25_s10, %s1992_s18  ;;  %p1998_p5 = scmp.lt.s32.totalorder %s1992_s18, %s1992_s18 }
   0xc   :  { %p1999_p6 = por %p1998_p5, %p1997_p4 }
   0xe   :  { %p2000_p7 = pnand %p1999_p6, %p1993_p3 }
  0x10   :  { %2003 = shalt.err (!%p2000_p7)
}
  0x11   :  { %s2055_s19 = smov 128   ;;  %s2056_s20 = smov 8  }
  0x12   :  { %30 = dma.hbm_to_vmem [thread:$0]  %s2331_s1, 6144, %s25_s10, [#allocation5], %s2055_s19, %s2055_s19, %s2056_s20  }
  0x13   :  { %s2057_s23 = smov [#allocation7]   ;;  %s2004_s27 = scalar_lea.hbm %s2334_s4, 6144 }
  0x14   :  { %s40_s24 = sshll.u32 %s2057_s23, 4  ;;  %p2005_p8 = scmp.ne.s32.totalorder %s2334_s4, %s2004_s27  ;;  %s41_s24 = int_to_ptr.vmem [resolvable:$true] %s40_s24 }
  0x15   :  { %p2008_p9 = scmp.lt.u32.totalorder %s2004_s27, %s2334_s4 }
  0x17   :  { %p2010_p10 = pnand %p2008_p9, %p2005_p8 }
  0x19   :  { %2013 = shalt.err (!%p2010_p10)
}
  0x1a   :  { %s2014_s12 = scalar_lea.vmem %s41_s24, 6144  ;;  %p2019_p12 = scmp.lt.s32.totalorder %s41_s24, %s41_s24 }
  0x1b   :  { %p2015_p11 = scmp.ne.s32.totalorder %s41_s24, %s2014_s12  ;;  %p2020_p13 = scmp.lt.s32.totalorder %s2014_s12, %s2014_s12 }
  0x1d   :  { %p2021_p0 = por %p2020_p13, %p2019_p12 }
  0x1f   :  { %p2022_p1 = pnand %p2021_p0, %p2015_p11 }
  0x21   :  { %2025 = shalt.err (!%p2022_p1)
}
  0x22   :  { %46 = dma.hbm_to_vmem [thread:$0]  %s2334_s4, 6144, %s41_s24, [#allocation8], %s2055_s19, %s2055_s19, %s2056_s20  }
  0x23   :  { %2048 = dma.done.wait [#allocation5], 6144  }
  0x24   :  { %2049 = vsyncadd [#allocation5], 4294961152 }
  0x25   :  { %2050 = dma.done.wait [#allocation8], 6144  }
  0x26   :  { %2051 = vsyncadd [#allocation8], 4294961152  ;;  %v2058_v0 = vmov 0.0   ;;  %v2059_v1 = vmov 0.0|0.0   ;;  %v121_v2 = vld [vmem:[#allocation4 + $0x80] sm:$0xff]  ;;  %v122_v3 = vld [vmem:[#allocation4 + $0x88] sm:$0xff] }
  0x27   :  { %61 = vst [vmem:[#allocation2 + $0x7] sm:$0x1] %v2058_v0  ;;  %62 = vst [vmem:[#allocation2 + $0x27] sm:$0x1] %v2058_v0  ;;  %1809 = vmatprep.subr.bf16.mxu1 %v2059_v1  ;;  %v123_v4 = vld [vmem:[#allocation4 + $0x90] sm:$0xff]  ;;  %v1713_v5 = vpack.c.bf16 %v122_v3, %v121_v2  ;;  %v124_v6 = vld [vmem:[#allocation4 + $0x98] sm:$0xff] }
  0x28   :  { %63 = vst [vmem:[#allocation2 + $0x18] sm:$0x1] %v2058_v0  ;;  %64 = vst [vmem:[#allocation2 + $0x38] sm:$0x1] %v2058_v0  ;;  %v1717_v7 = vpack.c.bf16 %v124_v6, %v123_v4  ;;  %v125_v8 = vld [vmem:[#allocation4 + $0xa0] sm:$0xff]  ;;  %v126_v9 = vld [vmem:[#allocation4 + $0xa8] sm:$0xff] }
  0x29   :  { %65 = vst [vmem:[#allocation3 + $0x7] sm:$0x1] %v2058_v0  ;;  %66 = vst [vmem:[#allocation3 + $0x27] sm:$0x1] %v2058_v0  ;;  %1714 = vmatprep.subr.bf16.mxu0 %v1713_v5  ;;  %v1721_v10 = vpack.c.bf16 %v126_v9, %v125_v8  ;;  %v69_v11 = vld [vmem:[%s2330_s0] sm:$0xff]  ;;  %v127_v12 = vld [vmem:[#allocation4 + $0xb0] sm:$0xff] }
  0x2a   :  { %67 = vst [vmem:[#allocation3 + $0x18] sm:$0x1] %v2058_v0  ;;  %68 = vst [vmem:[#allocation3 + $0x38] sm:$0x1] %v2058_v0  ;;  %1716 = vmatpush3.bf16.msra.mxu0 %v1713_v5  ;;  %v128_v13 = vld [vmem:[#allocation4 + $0xb8] sm:$0xff]  ;;  %1437 = vmatprep.mubr.f32.mxu0 %v69_v11  ;;  %v70_v14 = vld [vmem:[%s2330_s0 + $0x8] sm:$0xff] }
  0x2b   :  { %1718 = vmatprep.subr.bf16.mxu0 %v1717_v7  ;;  %73 = vst [vmem:[#allocation2 + $0x8] sm:$0xff] %v69_v11  ;;  %74 = vst [vmem:[#allocation2 + $0x10] sm:$0xff] %v70_v14  ;;  %v1725_v15 = vpack.c.bf16 %v128_v13, %v127_v12  ;;  %v129_v16 = vld [vmem:[#allocation4 + $0xc0] sm:$0xff]  ;;  %v130_v17 = vld [vmem:[#allocation4 + $0xc8] sm:$0xff]  ;;  %vm2060_vm0 = vmmov 0   ;;  %vm439_vm1 = vcmask 1040384  }
  0x2c   :  { %v71_v18 = vld [vmem:[%s2330_s0 + $0x10] sm:$0xff]  ;;  %v72_v19 = vld [vmem:[%s2330_s0 + $0x18] sm:$0xff]  ;;  %v1729_v20 = vpack.c.bf16 %v130_v17, %v129_v16  ;;  %v133_v24 = vld [vmem:[#allocation4 + $0xe0] sm:$0xff]  ;;  %1551 = vmatprep.mubr.msk.f32.mxu1 %vm2060_vm0, %v2058_v0  ;;  %vm547_vm2 = vcmask 64512  }
  0x2d   :  { %75 = vst [vmem:[#allocation2 + $0x28] sm:$0xff] %v71_v18  ;;  %76 = vst [vmem:[#allocation2 + $0x30] sm:$0xff] %v72_v19  ;;  %v131_v21 = vld [vmem:[#allocation4 + $0xd0] sm:$0xff]  ;;  %v132_v22 = vld [vmem:[#allocation4 + $0xd8] sm:$0xff] }
  0x2e   :  { %1720 = vmatpush3.bf16.msra.mxu0 %v1717_v7  ;;  %v1733_v23 = vpack.c.bf16 %v132_v22, %v131_v21  ;;  %v134_v25 = vld [vmem:[#allocation4 + $0xe8] sm:$0xff]  ;;  %v79_v26 = vld [vmem:[%s2337_s7] sm:$0xff]  ;;  %v81_v28 = vld [vmem:[%s2337_s7 + $0x10] sm:$0xff] }
  0x2f   :  { %1722 = vmatprep.subr.bf16.mxu0 %v1721_v10  ;;  %v80_v27 = vld [vmem:[%s2337_s7 + $0x8] sm:$0xff]  ;;  %v1737_v29 = vpack.c.bf16 %v134_v25, %v133_v24  ;;  %v82_v31 = vld [vmem:[%s2337_s7 + $0x18] sm:$0xff]  ;;  %v135_v32 = vld [vmem:[#allocation4 + $0xf0] sm:$0xff] }
  0x30   :  { %v2173_v30 = vpack.c.bf16 %v80_v27, %v79_v26  ;;  %v136_v33 = vld [vmem:[#allocation4 + $0xf8] sm:$0xff]  ;;  %v2179_v34 = vpack.c.bf16 %v82_v31, %v81_v28  ;;  %v100_v36 = vld [vmem:[#allocation4] sm:$0xff]  ;;  %v101_v37 = vld [vmem:[#allocation4 + $0x8] sm:$0xff] }
  0x31   :  { %v1741_v35 = vpack.c.bf16 %v136_v33, %v135_v32  ;;  %v1745_v38 = vpack.c.bf16 %v101_v37, %v100_v36  ;;  %v102_v39 = vld [vmem:[#allocation4 + $0x10] sm:$0xff]  ;;  %v103_v40 = vld [vmem:[#allocation4 + $0x18] sm:$0xff]  ;;  %v104_v42 = vld [vmem:[#allocation4 + $0x20] sm:$0xff] }
  0x32   :  { %1724 = vmatpush3.bf16.msra.mxu0 %v1721_v10  ;;  %1811 = vmatpush3.bf16.msra.mxu1 %v2173_v30  ;;  %v1749_v41 = vpack.c.bf16 %v103_v40, %v102_v39  ;;  %v105_v43 = vld [vmem:[#allocation4 + $0x28] sm:$0xff]  ;;  %v106_v46 = vld [vmem:[#allocation4 + $0x30] sm:$0xff]  ;;  %v107_v47 = vld [vmem:[#allocation4 + $0x38] sm:$0xff] }
  0x33   :  { %1726 = vmatprep.subr.bf16.mxu0 %v1725_v15  ;;  %1812 = vmatprep.subr.bf16.mxu1 %v2059_v1  ;;  %v1753_v44 = vpack.c.bf16 %v105_v43, %v104_v42  ;;  %v96_v45 = vld [vmem:[#allocation2 + $0x7] sm:$0xff]  ;;  %v1757_v48 = vpack.c.bf16 %v107_v47, %v106_v46  ;;  %v110_v52 = vld [vmem:[#allocation4 + $0x50] sm:$0xff]  ;;  %v111_v53 = vld [vmem:[#allocation4 + $0x58] sm:$0xff] }
  0x34   :  { %v108_v49 = vld [vmem:[#allocation4 + $0x40] sm:$0xff]  ;;  %v109_v50 = vld [vmem:[#allocation4 + $0x48] sm:$0xff]  ;;  %v1765_v54 = vpack.c.bf16 %v111_v53, %v110_v52  ;;  %v114_v58 = vld [vmem:[#allocation4 + $0x70] sm:$0xff] }
  0x35   :  { %v1761_v51 = vpack.c.bf16 %v109_v50, %v108_v49  ;;  %v112_v55 = vld [vmem:[#allocation4 + $0x60] sm:$0xff]  ;;  %v113_v56 = vld [vmem:[#allocation4 + $0x68] sm:$0xff]  ;;  %v115_v59 = vld [vmem:[#allocation4 + $0x78] sm:$0xff] }
  0x36   :  { %1728 = vmatpush3.bf16.msra.mxu0 %v1725_v15  ;;  %1814 = vmatpush3.bf16.msra.mxu1 %v2179_v34  ;;  %v1769_v57 = vpack.c.bf16 %v113_v56, %v112_v55  ;;  %v1773_v60 = vpack.c.bf16 %v115_v59, %v114_v58  ;;  %v312_v61 = vld [vmem:[#allocation4 + $0x100] sm:$0xff]  ;;  %v313_v62 = vld [vmem:[#allocation4 + $0x108] sm:$0xff]  ;;  %v314_v2 = vld [vmem:[#allocation4 + $0x110] sm:$0xff] }
  0x37   :  { %1730 = vmatprep.subr.bf16.mxu0 %v1729_v20  ;;  %1815 = vmatprep.subr.bf16.mxu1 %v2059_v1  ;;  %v1777_v63 = vpack.c.bf16 %v313_v62, %v312_v61  ;;  %v315_v3 = vld [vmem:[#allocation4 + $0x118] sm:$0xff]  ;;  %v97_v4 = vld [vmem:[#allocation2 + $0xf] sm:$0xff]  ;;  %v98_v6 = vld [vmem:[#allocation2 + $0x27] sm:$0xff] }
  0x38   :  { %v1781_v5 = vpack.c.bf16 %v315_v3, %v314_v2  ;;  %v316_v7 = vld [vmem:[#allocation4 + $0x120] sm:$0xff]  ;;  %v317_v8 = vld [vmem:[#allocation4 + $0x128] sm:$0xff]  ;;  %v318_v12 = vld [vmem:[#allocation4 + $0x130] sm:$0xff] }
  0x39   :  { %v99_v9 = vld [vmem:[#allocation2 + $0x2f] sm:$0xff]  ;;  %v1785_v10 = vpack.c.bf16 %v317_v8, %v316_v7  ;;  %v319_v13 = vld [vmem:[#allocation4 + $0x138] sm:$0xff]  ;;  %v320_v15 = vld [vmem:[#allocation4 + $0x140] sm:$0xff] }
  0x3a   :  { %1732 = vmatpush3.bf16.msra.mxu0 %v1729_v20  ;;  %v307_v11 = vld [vmem:[#allocation2 + $0x9] sm:$0xff]  ;;  %v324_v21 = vld [vmem:[#allocation4 + $0x160] sm:$0xff]  ;;  %v327_v25 = vld [vmem:[#allocation4 + $0x178] sm:$0xff] }
  0x3b   :  { %1734 = vmatprep.subr.bf16.mxu0 %v1733_v23  ;;  %v321_v16 = vld [vmem:[#allocation4 + $0x148] sm:$0xff]  ;;  %v326_v24 = vld [vmem:[#allocation4 + $0x170] sm:$0xff]  ;;  %v83_v31 = vld [vmem:[%s2337_s7 + $0x20] sm:$0xff] }
  0x3c   :  { %v1793_v17 = vpack.c.bf16 %v321_v16, %v320_v15  ;;  %v325_v22 = vld [vmem:[#allocation4 + $0x168] sm:$0xff]  ;;  %v1805_v26 = vpack.c.bf16 %v327_v25, %v326_v24  ;;  %v308_v27 = vld [vmem:[#allocation2 + $0x11] sm:$0xff]  ;;  %v87_v36 = vld [vmem:[%s2337_s7 + $0x40] sm:$0xff]  ;;  %v2061_v24 = vmov 1966171168  }
  0x3d   :  { %v309_v28 = vld [vmem:[#allocation2 + $0x29] sm:$0xff]  ;;  %v90_v40 = vld [vmem:[%s2337_s7 + $0x58] sm:$0xff]  ;;  %v91_v42 = vld [vmem:[%s2337_s7 + $0x60] sm:$0xff]  ;;  %v522_v25 = vunpack.c.l.s4 %v2061_v24 }
  0x3e   :  { %1736 = vmatpush3.bf16.msra.mxu0 %v1733_v23  ;;  %v1801_v23 = vpack.c.bf16 %v325_v22, %v324_v21  ;;  %v84_v32 = vld [vmem:[%s2337_s7 + $0x28] sm:$0xff]  ;;  %v89_v39 = vld [vmem:[%s2337_s7 + $0x50] sm:$0xff]  ;;  %v94_v46 = vld [vmem:[%s2337_s7 + $0x78] sm:$0xff] }
  0x3f   :  { %1738 = vmatprep.subr.bf16.mxu0 %v1737_v29  ;;  %v1816_v33 = vpack.c.bf16 %v84_v32, %v83_v31  ;;  %v88_v37 = vld [vmem:[%s2337_s7 + $0x48] sm:$0xff] }
  0x40   :  { %v92_v43 = vld [vmem:[%s2337_s7 + $0x68] sm:$0xff] }
  0x41   :  { %1817 = vmatpush3.bf16.msra.mxu1 %v1816_v33 }
  0x42   :  { %1740 = vmatpush3.bf16.msra.mxu0 %v1737_v29  ;;  %v310_v29 = vld [vmem:[#allocation2 + $0x31] sm:$0xff]  ;;  %1818 = vmatprep.subr.bf16.mxu1 %v2059_v1 }
  0x43   :  { %1742 = vmatprep.subr.bf16.mxu0 %v1741_v35 }
  0x46   :  { %1744 = vmatpush3.bf16.msra.mxu0 %v1741_v35 }
  0x47   :  { %1746 = vmatprep.subr.bf16.mxu0 %v1745_v38 }
  0x49   :  { %1438 = vmatmul.mubr.f32.vlgmr.msra.gmra.mrb[0].mxu0 %v70_v14  ;;  %v1789_v14 = vpack.c.bf16 %v319_v13, %v318_v12  ;;  %v2267_v12 = vld [vmem:[%s2338_s8] sm:$0xff] }
  0x4a   :  { %1748 = vmatpush3.bf16.msra.mxu0 %v1745_v38  ;;  %1440 = vmatprep.mubr.f32.mxu0 %v71_v18  ;;  %v322_v18 = vld [vmem:[#allocation4 + $0x150] sm:$0xff]  ;;  %v1822_v38 = vpack.c.bf16 %v88_v37, %v87_v36  ;;  %v697_v13 = vld [vmem:[#allocation7 + $0x80] sm:$0xff] }
  0x4b   :  { %1750 = vmatprep.subr.bf16.mxu0 %v1749_v41  ;;  %v78_v36 = vld [vmem:[%s2333_s3] sm:$0x1] }
  0x4d   :  { %1441 = vmatmul.mubr.f32.gmra.mrb[2].mxu0 %v72_v19  ;;  %v323_v19 = vld [vmem:[#allocation4 + $0x158] sm:$0xff] }
  0x4e   :  { %1752 = vmatpush3.bf16.msra.mxu0 %v1749_v41  ;;  %1475 = vmatprep.mubr.f32.mxu0 %v96_v45  ;;  %v1797_v20 = vpack.c.bf16 %v323_v19, %v322_v18  ;;  %v1825_v41 = vpack.c.bf16 %v90_v40, %v89_v39  ;;  %v93_v45 = vld [vmem:[%s2337_s7 + $0x70] sm:$0xff] }
  0x4f   :  { %1754 = vmatprep.subr.bf16.mxu0 %v1753_v44  ;;  %v1831_v47 = vpack.c.bf16 %v94_v46, %v93_v45  ;;  %v699_v40 = vld [vmem:[#allocation7 + $0x90] sm:$0xff]  ;;  %v701_v45 = vld [vmem:[#allocation7 + $0xa0] sm:$0xff]  ;;  %v702_v46 = vld [vmem:[#allocation7 + $0xa8] sm:$0xff] }
  0x52   :  { %1756 = vmatpush3.bf16.msra.mxu0 %v1753_v44  ;;  %v1828_v44 = vpack.c.bf16 %v92_v43, %v91_v42 }
  0x53   :  { %1758 = vmatprep.subr.bf16.mxu0 %v1757_v48 }
  0x56   :  { %1760 = vmatpush3.bf16.msra.mxu0 %v1757_v48 }
  0x57   :  { %1762 = vmatprep.subr.bf16.mxu0 %v1761_v51 }
  0x5a   :  { %1764 = vmatpush3.bf16.msra.mxu0 %v1761_v51 }
  0x5b   :  { %1766 = vmatprep.subr.bf16.mxu0 %v1765_v54 }
  0x5e   :  { %1768 = vmatpush3.bf16.msra.mxu0 %v1765_v54 }
  0x5f   :  { %1770 = vmatprep.subr.bf16.mxu0 %v1769_v57 }
  0x62   :  { %1772 = vmatpush3.bf16.msra.mxu0 %v1769_v57 }
  0x63   :  { %1774 = vmatprep.subr.bf16.mxu0 %v1773_v60 }
  0x66   :  { %1776 = vmatpush3.bf16.msra.mxu0 %v1773_v60 }
  0x67   :  { %1778 = vmatprep.subr.bf16.mxu0 %v1777_v63 }
  0x69   :  { %1476 = vmatmul.mubr.f32.vlgmr.msra.gmra.mrb[0].mxu0 %v97_v4 }
  0x6a   :  { %1780 = vmatpush3.bf16.msra.mxu0 %v1777_v63  ;;  %1478 = vmatprep.mubr.f32.mxu0 %v98_v6 }
  0x6b   :  { %1782 = vmatprep.subr.bf16.mxu0 %v1781_v5 }
  0x6d   :  { %1479 = vmatmul.mubr.f32.gmra.mrb[2].mxu0 %v99_v9 }
  0x6e   :  { %1784 = vmatpush3.bf16.msra.mxu0 %v1781_v5  ;;  %1513 = vmatprep.mubr.f32.mxu0 %v307_v11 }
  0x6f   :  { %1786 = vmatprep.subr.bf16.mxu0 %v1785_v10 }
  0x72   :  { %1788 = vmatpush3.bf16.msra.mxu0 %v1785_v10 }
  0x73   :  { %1790 = vmatprep.subr.bf16.mxu0 %v1789_v14 }
  0x76   :  { %1792 = vmatpush3.bf16.msra.mxu0 %v1789_v14  ;;  %v698_v14 = vld [vmem:[#allocation7 + $0x88] sm:$0xff] }
  0x77   :  { %1794 = vmatprep.subr.bf16.mxu0 %v1793_v17  ;;  %v1833_v15 = vpack.c.bf16 %v698_v14, %v697_v13 }
  0x7a   :  { %1796 = vmatpush3.bf16.msra.mxu0 %v1793_v17 }
  0x7b   :  { %1798 = vmatprep.subr.bf16.mxu0 %v1797_v20 }
  0x7e   :  { %1800 = vmatpush3.bf16.msra.mxu0 %v1797_v20 }
  0x7f   :  { %1802 = vmatprep.subr.bf16.mxu0 %v1801_v23 }
  0x82   :  { %1804 = vmatpush3.bf16.msra.mxu0 %v1801_v23 }
  0x83   :  { %1806 = vmatprep.subr.bf16.mxu0 %v1805_v26 }
  0x86   :  { %1808 = vmatpush3.bf16.msra.mxu0 %v1805_v26  ;;  %v524_v26 = vlaneseq }
  0x87   :  { %1929 = vmatprep.subr.bf16.mxu0 %v2059_v1 }
  0x89   :  { %1514 = vmatmul.mubr.f32.vlgmr.msra.gmra.mrb[0].mxu0 %v308_v27  ;;  %v523_v27 = vunpack.c.0.s8 %v522_v25 }
  0x8a   :  { %1516 = vmatprep.mubr.f32.mxu0 %v309_v28  ;;  %1931 = vmatpush3.bf16.msra.mxu0 %v2173_v30  ;;  %v85_v30 = vld [vmem:[%s2337_s7 + $0x30] sm:$0xff]  ;;  %v2270_v28 = vshrl.u32 %v524_v26, 7 }
  0x8b   :  { %1932 = vmatprep.subr.bf16.mxu0 %v2059_v1 }
  0x8d   :  { %1517 = vmatmul.mubr.f32.gmra.mrb[2].mxu0 %v310_v29  ;;  %v2273_v29 = vsub.s32 %v523_v27, %v2270_v28 }
  0x8e   :  { %1934 = vmatpush3.bf16.msra.mxu0 %v2179_v34  ;;  %v86_v34 = vld [vmem:[%s2337_s7 + $0x38] sm:$0xff]  ;;  %1705 = vmatprep.mubr.msk.f32.mxu0 %vm2060_vm0, %v2058_v0 }
  0x8f   :  { %1935 = vmatprep.subr.bf16.mxu0 %v2059_v1  ;;  %v1819_v35 = vpack.c.bf16 %v86_v34, %v85_v30  ;;  %v77_v30 = vld [vmem:[%s2332_s2] sm:$0x1] }
  0x91   :  { %1820 = vmatpush3.bf16.msra.mxu1 %v1819_v35 }
  0x92   :  { %1937 = vmatpush3.bf16.msra.mxu0 %v1816_v33  ;;  %1821 = vmatprep.subr.bf16.mxu1 %v2059_v1 }
  0x93   :  { %1938 = vmatprep.subr.bf16.mxu0 %v2059_v1 }
  0x95   :  { %1823 = vmatpush3.bf16.msra.mxu1 %v1822_v38 }
  0x96   :  { %1940 = vmatpush3.bf16.msra.mxu0 %v1819_v35  ;;  %1824 = vmatprep.subr.bf16.mxu1 %v2059_v1 }
  0x97   :  { %1941 = vmatprep.subr.bf16.mxu0 %v2059_v1 }
  0x99   :  { %1826 = vmatpush3.bf16.msra.mxu1 %v1825_v41 }
  0x9a   :  { %1943 = vmatpush3.bf16.msra.mxu0 %v1822_v38  ;;  %1827 = vmatprep.subr.bf16.mxu1 %v2059_v1  ;;  %v2284_v38 = vsub.s32 0, %v2270_v28 }
  0x9b   :  { %1944 = vmatprep.subr.bf16.mxu0 %v2059_v1 }
  0x9d   :  { %1829 = vmatpush3.bf16.msra.mxu1 %v1828_v44 }
  0x9e   :  { %1946 = vmatpush3.bf16.msra.mxu0 %v1825_v41  ;;  %1830 = vmatprep.subr.bf16.mxu1 %v2059_v1  ;;  %v700_v41 = vld [vmem:[#allocation7 + $0x98] sm:$0xff] }
  0x9f   :  { %1947 = vmatprep.subr.bf16.mxu0 %v2059_v1  ;;  %v1837_v43 = vpack.c.bf16 %v700_v41, %v699_v40  ;;  %v686_v41 = vld [vmem:[#allocation7 + $0x50] sm:$0xff] }
  0xa1   :  { %1832 = vmatpush3.bf16.msra.mxu1 %v1831_v47 }
  0xa2   :  { %1949 = vmatpush3.bf16.msra.mxu0 %v1828_v44  ;;  %1554 = vmatprep.subr.mxu1 %v2058_v0 }
  0xa3   :  { %1950 = vmatprep.subr.bf16.mxu0 %v2059_v1 }
  0xa6   :  { %1952 = vmatpush3.bf16.msra.mxu0 %v1831_v47  ;;  %v1841_v47 = vpack.c.bf16 %v702_v46, %v701_v45  ;;  %v689_v45 = vld [vmem:[#allocation7 + $0x68] sm:$0xff] }
  0xa7   :  { %1708 = vmatprep.subr.mxu0 %v2058_v0 }
 0x15c   :  { %v2241_v48 = vpop.f32.mrb[0].mxu0 }
 0x15d   :  { %v427_v49 = vmul.f32 %v2241_v48, %v2241_v48  ;;  %v2245_v50 = vpop.f32.mrb[1].mxu0 }
 0x15e   :  { %v417_v51 = vadd.f32 %v2241_v48, %v2245_v50  ;;  %v426_v52 = vmul.f32 %v2245_v50, %v2245_v50 }
 0x160   :  { %v430_v1 = vadd.f32 %v427_v49, %v426_v52  ;;  %v2251_v53 = vpop.f32.mrb[2].mxu0  ;;  %v703_v49 = vld [vmem:[#allocation7 + $0xb0] sm:$0xff] }
 0x161   :  { %v2253_v54 = vpop.f32.mrb[3].mxu0  ;;  %v429_v57 = vmul.f32 %v2251_v53, %v2251_v53 }
 0x162   :  { %v418_v55 = vadd.f32 %v417_v51, %v2253_v54  ;;  %v428_v56 = vmul.f32 %v2253_v54, %v2253_v54  ;;  %v704_v51 = vld [vmem:[#allocation7 + $0xb8] sm:$0xff] }
 0x163   :  { %v1845_v52 = vpack.c.bf16 %v704_v51, %v703_v49  ;;  %v691_v49 = vld [vmem:[#allocation7 + $0x78] sm:$0xff] }
 0x164   :  { %v419_v58 = vadd.f32 %v2251_v53, %v418_v55  ;;  %v431_v59 = vadd.f32 %v430_v1, %v428_v56  ;;  %v705_v1 = vld [vmem:[#allocation7 + $0xc0] sm:$0xff]  ;;  %v706_v55 = vld [vmem:[#allocation7 + $0xc8] sm:$0xff] }
 0x165   :  { %v1849_v56 = vpack.c.bf16 %v706_v55, %v705_v1  ;;  %v889_v1 = vld [vmem:[#allocation7 + $0x108] sm:$0xff] }
 0x166   :  { %v420_v60 = vrot.slane %v419_v58, 4  ;;  %v432_v61 = vadd.f32 %v431_v59, %v429_v57  ;;  %v707_v57 = vld [vmem:[#allocation7 + $0xd0] sm:$0xff] }
 0x168   :  { %v421_v62 = vadd.f32 %v420_v60, %v419_v58  ;;  %v433_v63 = vrot.slane %v432_v61, 4  ;;  %v708_v58 = vld [vmem:[#allocation7 + $0xd8] sm:$0xff]  ;;  %v709_v60 = vld [vmem:[#allocation7 + $0xe0] sm:$0xff] }
 0x169   :  { %v1853_v59 = vpack.c.bf16 %v708_v58, %v707_v57  ;;  %v891_v57 = vld [vmem:[#allocation7 + $0x118] sm:$0xff] }
 0x16a   :  { %v422_v2 = vrot.slane %v421_v62, 2  ;;  %v434_v3 = vadd.f32 %v433_v63, %v432_v61  ;;  %v710_v61 = vld [vmem:[#allocation7 + $0xe8] sm:$0xff]  ;;  %v711_v63 = vld [vmem:[#allocation7 + $0xf0] sm:$0xff] }
 0x16c   :  { %v423_v4 = vadd.f32 %v422_v2, %v421_v62  ;;  %v435_v5 = vrot.slane %v434_v3, 2  ;;  %v1857_v62 = vpack.c.bf16 %v710_v61, %v709_v60  ;;  %v712_v2 = vld [vmem:[#allocation7 + $0xf8] sm:$0xff]  ;;  %v892_v60 = vld [vmem:[#allocation7 + $0x120] sm:$0xff]  ;;  %v893_v61 = vld [vmem:[#allocation7 + $0x128] sm:$0xff] }
 0x16e   :  { %v424_v6 = vrot.slane %v423_v4, 1  ;;  %v436_v7 = vadd.f32 %v435_v5, %v434_v3  ;;  %v1861_v3 = vpack.c.bf16 %v712_v2, %v711_v63  ;;  %v677_v5 = vld [vmem:[#allocation7 + $0x8] sm:$0xff]  ;;  %v1905_v63 = vpack.c.bf16 %v893_v61, %v892_v60 }
 0x170   :  { %v437_v8 = vrot.slane %v436_v7, 1  ;;  %v425_v9 = vadd.f32 %v424_v6, %v423_v4  ;;  %v676_v4 = vld [vmem:[#allocation7] sm:$0xff] }
 0x171   :  { %v1865_v6 = vpack.c.bf16 %v677_v5, %v676_v4  ;;  %v895_v4 = vld [vmem:[#allocation7 + $0x138] sm:$0xff] }
 0x172   :  { %v438_v10 = vadd.f32 %v437_v8, %v436_v7  ;;  %v631_v7 = vsub.s32 1, %v2270_v28 }
 0x174   :  { %v440_v11 = vsel %vm439_vm1, %v425_v9, %v438_v10 }
 0x175   :  { %1552 = vmatmul.mubr.f32.vlgmr.msra.gmra.mrb[0].mxu1 %v440_v11 }
 0x176   :  { %1556 = vmatprep.mubr.msk.f32.mxu1 %vm2060_vm0, %v2058_v0  ;;  %1555 = vmatpush3.msra.mxu1 %v2267_v12 }
 0x177   :  { %1834 = vmatprep.subr.bf16.mxu1 %v1833_v15 }
 0x248   :  { %v507_v16 = vpop.f32.mrb[0].mxu1 }
 0x249   :  { %v511_v17 = vmul.f32 0.001953125, %v507_v16  ;;  %v1553_v18 = vpop.f32.mrb[1].mxu1 }
 0x24b   :  { %v512_v19 = vmul.f32 %v511_v17, %v511_v17 }
 0x24d   :  { %v514_v20 = vrot.slane %v512_v19, 7 }
 0x24f   :  { %v516_v21 = vsub.f32 %v511_v17, %v514_v20 }
 0x251   :  { %v517_v22 = vmax.f32 %v516_v21, 0.0  ;;  %v678_v21 = vld [vmem:[#allocation7 + $0x10] sm:$0xff] }
 0x253   :  { %v518_v23 = vadd.f32 1e-05, %v517_v22  ;;  %v679_v22 = vld [vmem:[#allocation7 + $0x18] sm:$0xff] }
 0x255   :  { %1978 = vrsqrt.f32 %v518_v23 }
 0x25f   :  { %v1979_v31 = vpop.eup %1978 }
 0x260   :  { %v527_v32 = vrot.slane %v1979_v31, %v2273_v29 }
 0x262   :  { %v528_v33 = vcombine.high %v527_v32, %v527_v32  ;;  %v681_v32 = vld [vmem:[#allocation7 + $0x28] sm:$0xff] }
 0x264   :  { %v535_v34 = vrot.slane %v528_v33, %v2273_v29 }
 0x266   :  { %v537_v35 = vmul.f32 %v535_v34, %v77_v30  ;;  %v682_v30 = vld [vmem:[#allocation7 + $0x30] sm:$0xff]  ;;  %v683_v34 = vld [vmem:[#allocation7 + $0x38] sm:$0xff] }
 0x268   :  { %v538_v37 = vmul.f32 %v537_v35, %v511_v17 }
 0x26a   :  { %v539_v39 = vsub.f32 %v78_v36, %v538_v37  ;;  %v1877_v36 = vpack.c.bf16 %v683_v34, %v682_v30  ;;  %v684_v37 = vld [vmem:[#allocation7 + $0x40] sm:$0xff] }
 0x26c   :  { %v544_v42 = vrot.slane %v539_v39, %v2284_v38  ;;  %v685_v39 = vld [vmem:[#allocation7 + $0x48] sm:$0xff] }
 0x26d   :  { %v1881_v40 = vpack.c.bf16 %v685_v39, %v684_v37 }
 0x26e   :  { %v546_v44 = vsel %vm439_vm1, %v537_v35, %v544_v42  ;;  %v687_v42 = vld [vmem:[#allocation7 + $0x58] sm:$0xff] }
 0x26f   :  { %1557 = vmatmul.mubr.msk.f32.vlgmr.msra.gmra.mrb[2].mxu1 %vm547_vm2, %v546_v44  ;;  %v688_v44 = vld [vmem:[#allocation7 + $0x60] sm:$0xff] }
 0x270   :  { %1836 = vmatpush3.bf16.msra.mxu1 %v1833_v15  ;;  %v1889_v46 = vpack.c.bf16 %v689_v45, %v688_v44 }
 0x271   :  { %1838 = vmatprep.subr.bf16.mxu1 %v1837_v43 }
 0x274   :  { %1840 = vmatpush3.bf16.msra.mxu1 %v1837_v43  ;;  %v1885_v43 = vpack.c.bf16 %v687_v42, %v686_v41 }
 0x275   :  { %1842 = vmatprep.subr.bf16.mxu1 %v1841_v47 }
 0x278   :  { %1844 = vmatpush3.bf16.msra.mxu1 %v1841_v47  ;;  %v690_v47 = vld [vmem:[#allocation7 + $0x70] sm:$0xff] }
 0x279   :  { %1846 = vmatprep.subr.bf16.mxu1 %v1845_v52  ;;  %v1893_v51 = vpack.c.bf16 %v691_v49, %v690_v47 }
 0x27c   :  { %1848 = vmatpush3.bf16.msra.mxu1 %v1845_v52  ;;  %v888_v52 = vld [vmem:[#allocation7 + $0x100] sm:$0xff] }
 0x27d   :  { %1850 = vmatprep.subr.bf16.mxu1 %v1849_v56  ;;  %v1897_v55 = vpack.c.bf16 %v889_v1, %v888_v52 }
 0x280   :  { %1852 = vmatpush3.bf16.msra.mxu1 %v1849_v56  ;;  %v890_v56 = vld [vmem:[#allocation7 + $0x110] sm:$0xff] }
 0x281   :  { %1854 = vmatprep.subr.bf16.mxu1 %v1853_v59  ;;  %v1901_v58 = vpack.c.bf16 %v891_v57, %v890_v56 }
 0x284   :  { %1856 = vmatpush3.bf16.msra.mxu1 %v1853_v59 }
 0x285   :  { %1858 = vmatprep.subr.bf16.mxu1 %v1857_v62 }
 0x288   :  { %1860 = vmatpush3.bf16.msra.mxu1 %v1857_v62 }
 0x289   :  { %1862 = vmatprep.subr.bf16.mxu1 %v1861_v3 }
 0x28c   :  { %1864 = vmatpush3.bf16.msra.mxu1 %v1861_v3  ;;  %v894_v3 = vld [vmem:[#allocation7 + $0x130] sm:$0xff] }
 0x28d   :  { %1866 = vmatprep.subr.bf16.mxu1 %v1865_v6 }
 0x342   :  { %v617_v8 = vpop.f32.mrb[2].mxu1 }
 0x343   :  { %v624_v9 = vrot.slane %v617_v8, %v2284_v38  ;;  %v1558_v10 = vpop.f32.mrb[3].mxu1  ;;  %v632_v11 = vrot.slane %v617_v8, %v631_v7  ;;  %v896_v8 = vld [vmem:[#allocation7 + $0x140] sm:$0xff] }
 0x345   :  { %v625_v13 = vmul.f32 %v624_v9, %v2245_v50  ;;  %v626_v14 = vmul.f32 %v2241_v48, %v624_v9  ;;  %v627_v15 = vmul.f32 %v624_v9, %v2253_v54  ;;  %v628_v16 = vmul.f32 %v2251_v53, %v624_v9  ;;  %v680_v53 = vld [vmem:[#allocation7 + $0x20] sm:$0xff]  ;;  %v897_v9 = vld [vmem:[#allocation7 + $0x148] sm:$0xff] }
 0x346   :  { %v1869_v54 = vpack.c.bf16 %v679_v22, %v678_v21  ;;  %v1873_v33 = vpack.c.bf16 %v681_v32, %v680_v53  ;;  %v1913_v10 = vpack.c.bf16 %v897_v9, %v896_v8 }
 0x347   :  { %v633_v17 = vadd.f32 %v632_v11, %v625_v13  ;;  %v634_v18 = vadd.f32 %v632_v11, %v626_v14  ;;  %v635_v19 = vadd.f32 %v632_v11, %v627_v15  ;;  %v636_v20 = vadd.f32 %v632_v11, %v628_v16  ;;  %v898_v11 = vld [vmem:[#allocation7 + $0x150] sm:$0xff]  ;;  %v899_v13 = vld [vmem:[#allocation7 + $0x158] sm:$0xff]  ;;  %v900_v15 = vld [vmem:[#allocation7 + $0x160] sm:$0xff] }
 0x348   :  { %v1917_v14 = vpack.c.bf16 %v899_v13, %v898_v11  ;;  %v901_v16 = vld [vmem:[#allocation7 + $0x168] sm:$0xff] }
 0x349   :  { %vm637_vm3 = vcmp.ge.f32.partialorder %v633_v17, 0.0  ;;  %vm638_vm4 = vcmp.ge.f32.partialorder %v634_v18, 0.0  ;;  %vm639_vm5 = vcmp.ge.f32.partialorder %v635_v19, 0.0  ;;  %vm640_vm6 = vcmp.ge.f32.partialorder %v636_v20, 0.0 }
 0x34a   :  { %v641_v23 = vmul.f32 0.01, %v633_v17  ;;  %v642_v24 = vmul.f32 0.01, %v634_v18  ;;  %v643_v25 = vmul.f32 0.01, %v635_v19 }
 0x34b   :  { %v644_v50 = vmul.f32 0.01, %v636_v20 }
 0x34c   :  { %v645_v26 = vsel %vm637_vm3, %v633_v17, %v641_v23  ;;  %v646_v48 = vsel %vm638_vm4, %v634_v18, %v642_v24  ;;  %v647_v27 = vsel %vm639_vm5, %v635_v19, %v643_v25  ;;  %v1921_v17 = vpack.c.bf16 %v901_v16, %v900_v15  ;;  %v902_v18 = vld [vmem:[#allocation7 + $0x170] sm:$0xff]  ;;  %v903_v19 = vld [vmem:[#allocation7 + $0x178] sm:$0xff] }
 0x34d   :  { %v648_v31 = vsel %vm640_vm6, %v636_v20, %v644_v50  ;;  %649 = vst [vmem:[#allocation3 + $0x8] sm:$0xff] %v645_v26  ;;  %650 = vst [vmem:[#allocation3 + $0x10] sm:$0xff] %v646_v48  ;;  %1591 = vmatprep.mubr.f32.mxu1 %v645_v26  ;;  %v1925_v20 = vpack.c.bf16 %v903_v19, %v902_v18 }
 0x34e   :  { %651 = vst [vmem:[#allocation3 + $0x28] sm:$0xff] %v647_v27  ;;  %652 = vst [vmem:[#allocation3 + $0x30] sm:$0xff] %v648_v31  ;;  %1592 = vmatmul.mubr.f32.vlgmr.msra.gmra.mrb[4].mxu1 %v646_v48 }
 0x34f   :  { %1868 = vmatpush3.bf16.msra.mxu1 %v1865_v6  ;;  %1594 = vmatprep.mubr.f32.mxu1 %v647_v27  ;;  %v1909_v6 = vpack.c.bf16 %v895_v4, %v894_v3  ;;  %v654_v3 = vld [vmem:[%s2336_s6] sm:$0x1] }
 0x350   :  { %1870 = vmatprep.subr.bf16.mxu1 %v1869_v54 }
 0x352   :  { %1595 = vmatmul.mubr.f32.gmra.mrb[6].mxu1 %v648_v31 }
 0x353   :  { %1872 = vmatpush3.bf16.msra.mxu1 %v1869_v54 }
 0x354   :  { %v672_v35 = vld [vmem:[#allocation3 + $0x7] sm:$0xff]  ;;  %1874 = vmatprep.subr.bf16.mxu1 %v1873_v33  ;;  %v673_v59 = vld [vmem:[#allocation3 + $0xf] sm:$0xff] }
 0x355   :  { %1629 = vmatprep.mubr.f32.mxu1 %v672_v35  ;;  %v674_v62 = vld [vmem:[#allocation3 + $0x27] sm:$0xff]  ;;  %v675_v2 = vld [vmem:[#allocation3 + $0x2f] sm:$0xff] }
 0x356   :  { %v883_v5 = vld [vmem:[#allocation3 + $0x9] sm:$0xff]  ;;  %v884_v21 = vld [vmem:[#allocation3 + $0x11] sm:$0xff] }
 0x357   :  { %1876 = vmatpush3.bf16.msra.mxu1 %v1873_v33  ;;  %v885_v22 = vld [vmem:[#allocation3 + $0x29] sm:$0xff]  ;;  %v886_v23 = vld [vmem:[#allocation3 + $0x31] sm:$0xff] }
 0x358   :  { %1878 = vmatprep.subr.bf16.mxu1 %v1877_v36 }
 0x35b   :  { %1880 = vmatpush3.bf16.msra.mxu1 %v1877_v36 }
 0x35c   :  { %1882 = vmatprep.subr.bf16.mxu1 %v1881_v40 }
 0x35f   :  { %1884 = vmatpush3.bf16.msra.mxu1 %v1881_v40 }
 0x360   :  { %1886 = vmatprep.subr.bf16.mxu1 %v1885_v43 }
 0x363   :  { %1888 = vmatpush3.bf16.msra.mxu1 %v1885_v43 }
 0x364   :  { %1890 = vmatprep.subr.bf16.mxu1 %v1889_v46 }
 0x367   :  { %1892 = vmatpush3.bf16.msra.mxu1 %v1889_v46 }
 0x368   :  { %1894 = vmatprep.subr.bf16.mxu1 %v1893_v51 }
 0x36b   :  { %1896 = vmatpush3.bf16.msra.mxu1 %v1893_v51 }
 0x36c   :  { %1898 = vmatprep.subr.bf16.mxu1 %v1897_v55 }
 0x36e   :  { %1630 = vmatmul.mubr.f32.vlgmr.msra.gmra.mrb[4].mxu1 %v673_v59 }
 0x36f   :  { %1632 = vmatprep.mubr.f32.mxu1 %v674_v62  ;;  %1900 = vmatpush3.bf16.msra.mxu1 %v1897_v55 }
 0x370   :  { %1902 = vmatprep.subr.bf16.mxu1 %v1901_v58 }
 0x372   :  { %1633 = vmatmul.mubr.f32.gmra.mrb[6].mxu1 %v675_v2 }
 0x373   :  { %1904 = vmatpush3.bf16.msra.mxu1 %v1901_v58  ;;  %1667 = vmatprep.mubr.f32.mxu1 %v883_v5 }
 0x374   :  { %1906 = vmatprep.subr.bf16.mxu1 %v1905_v63 }
 0x377   :  { %1908 = vmatpush3.bf16.msra.mxu1 %v1905_v63 }
 0x378   :  { %1910 = vmatprep.subr.bf16.mxu1 %v1909_v6 }
 0x37b   :  { %1912 = vmatpush3.bf16.msra.mxu1 %v1909_v6 }
 0x37c   :  { %1914 = vmatprep.subr.bf16.mxu1 %v1913_v10 }
 0x37f   :  { %1916 = vmatpush3.bf16.msra.mxu1 %v1913_v10 }
 0x380   :  { %1918 = vmatprep.subr.bf16.mxu1 %v1917_v14 }
 0x383   :  { %1920 = vmatpush3.bf16.msra.mxu1 %v1917_v14 }
 0x384   :  { %1922 = vmatprep.subr.bf16.mxu1 %v1921_v17 }
 0x387   :  { %1924 = vmatpush3.bf16.msra.mxu1 %v1921_v17 }
 0x388   :  { %1926 = vmatprep.subr.bf16.mxu1 %v1925_v20 }
 0x38b   :  { %1928 = vmatpush3.bf16.msra.mxu1 %v1925_v20 }
 0x38e   :  { %1668 = vmatmul.mubr.f32.vlgmr.msra.gmra.mrb[4].mxu1 %v884_v21 }
 0x38f   :  { %1670 = vmatprep.mubr.f32.mxu1 %v885_v22 }
 0x392   :  { %1671 = vmatmul.mubr.f32.gmra.mrb[6].mxu1 %v886_v23 }
 0x461   :  { %v1669_v24 = vpop.f32.mrb[4].mxu1 }
 0x462   :  { %v1003_v25 = vmul.f32 %v1669_v24, %v1669_v24  ;;  %v970_v50 = vpop.f32.mrb[5].mxu1 }
 0x463   :  { %v993_v26 = vadd.f32 %v1669_v24, %v970_v50  ;;  %v1002_v48 = vmul.f32 %v970_v50, %v970_v50 }
 0x465   :  { %v1006_v27 = vadd.f32 %v1003_v25, %v1002_v48  ;;  %v1672_v54 = vpop.f32.mrb[6].mxu1 }
 0x466   :  { %v980_v31 = vpop.f32.mrb[7].mxu1  ;;  %v1005_v33 = vmul.f32 %v1672_v54, %v1672_v54 }
 0x467   :  { %v994_v53 = vadd.f32 %v993_v26, %v980_v31  ;;  %v1004_v32 = vmul.f32 %v980_v31, %v980_v31 }
 0x469   :  { %v995_v30 = vadd.f32 %v1672_v54, %v994_v53  ;;  %v1007_v34 = vadd.f32 %v1006_v27, %v1004_v32 }
 0x46b   :  { %v996_v35 = vrot.slane %v995_v30, 4  ;;  %v1008_v36 = vadd.f32 %v1007_v34, %v1005_v33 }
 0x46d   :  { %v997_v37 = vadd.f32 %v996_v35, %v995_v30  ;;  %v1009_v39 = vrot.slane %v1008_v36, 4 }
 0x46f   :  { %v998_v40 = vrot.slane %v997_v37, 2  ;;  %v1010_v41 = vadd.f32 %v1009_v39, %v1008_v36 }
 0x471   :  { %v999_v42 = vadd.f32 %v998_v40, %v997_v37  ;;  %v1011_v43 = vrot.slane %v1010_v41, 2 }
 0x473   :  { %v1000_v44 = vrot.slane %v999_v42, 1  ;;  %v1012_v45 = vadd.f32 %v1011_v43, %v1010_v41 }
 0x475   :  { %v1013_v46 = vrot.slane %v1012_v45, 1  ;;  %v1001_v47 = vadd.f32 %v1000_v44, %v999_v42 }
 0x477   :  { %v1014_v49 = vadd.f32 %v1013_v46, %v1012_v45 }
 0x479   :  { %v1015_v51 = vsel %vm439_vm1, %v1001_v47, %v1014_v49 }
 0x47a   :  { %1706 = vmatmul.mubr.f32.vlgmr.msra.gmra.mrb[4].mxu0 %v1015_v51 }
 0x47b   :  { %1709 = vmatpush3.msra.mxu0 %v2267_v12  ;;  %1710 = vmatprep.mubr.msk.f32.mxu0 %vm2060_vm0, %v2058_v0  ;;  %v653_v12 = vld [vmem:[%s2335_s5] sm:$0x1]  ;;  %s2062_s5 = smov [#allocation9]  }
 0x47c   :  { %s1232_s6 = sshll.u32 %s2062_s5, 4  ;;  %s1233_s6 = int_to_ptr.vmem [resolvable:$true] %s1232_s6 }
 0x47d   :  { %s2026_s14 = scalar_lea.vmem %s1233_s6, 512  ;;  %p2031_p3 = scmp.lt.s32.totalorder %s1233_s6, %s1233_s6 }
 0x47e   :  { %p2027_p2 = scmp.ne.s32.totalorder %s1233_s6, %s2026_s14  ;;  %p2032_p4 = scmp.lt.s32.totalorder %s2026_s14, %s2026_s14 }
 0x480   :  { %p2033_p5 = por %p2032_p4, %p2031_p3 }
 0x482   :  { %p2034_p6 = pnand %p2033_p5, %p2027_p2 }
 0x54d   :  { %v1082_v52 = vpop.f32.mrb[4].mxu0 }
 0x54e   :  { %v1086_v1 = vmul.f32 0.001953125, %v1082_v52  ;;  %v1707_v55 = vpop.f32.mrb[5].mxu0 }
 0x550   :  { %v1087_v56 = vmul.f32 %v1086_v1, %v1086_v1 }
 0x552   :  { %v1089_v57 = vrot.slane %v1087_v56, 7 }
 0x554   :  { %v1091_v58 = vsub.f32 %v1086_v1, %v1089_v57 }
 0x556   :  { %v1092_v59 = vmax.f32 %v1091_v58, 0.0 }
 0x558   :  { %v1093_v60 = vadd.f32 1e-05, %v1092_v59 }
 0x55a   :  { %1980 = vrsqrt.f32 %v1093_v60 }
 0x564   :  { %v1981_v61 = vpop.eup %1980 }
 0x565   :  { %v1102_v62 = vrot.slane %v1981_v61, %v2273_v29 }
 0x567   :  { %v1103_v63 = vcombine.high %v1102_v62, %v1102_v62 }
 0x569   :  { %v1110_v2 = vrot.slane %v1103_v63, %v2273_v29 }
 0x56b   :  { %v1112_v0 = vmul.f32 %v1110_v2, %v653_v12 }
 0x56d   :  { %v1113_v4 = vmul.f32 %v1112_v0, %v1086_v1 }
 0x56f   :  { %v1114_v5 = vsub.f32 %v654_v3, %v1113_v4 }
 0x571   :  { %v1119_v6 = vrot.slane %v1114_v5, %v2284_v38 }
 0x573   :  { %v1121_v8 = vsel %vm439_vm1, %v1112_v0, %v1119_v6 }
 0x574   :  { %1711 = vmatmul.mubr.msk.f32.vlgmr.msra.gmra.mrb[6].mxu0 %vm547_vm2, %v1121_v8 }
 0x647   :  { %v1191_v9 = vpop.f32.mrb[6].mxu0 }
 0x648   :  { %v1198_v10 = vrot.slane %v1191_v9, %v2284_v38  ;;  %v1712_v11 = vpop.f32.mrb[7].mxu0  ;;  %v1206_v29 = vrot.slane %v1191_v9, %v631_v7 }
 0x64a   :  { %v1199_v13 = vmul.f32 %v1198_v10, %v970_v50  ;;  %v1200_v14 = vmul.f32 %v1669_v24, %v1198_v10  ;;  %v1201_v15 = vmul.f32 %v1198_v10, %v980_v31  ;;  %v1202_v16 = vmul.f32 %v1672_v54, %v1198_v10 }
 0x64c   :  { %v1207_v17 = vadd.f32 %v1206_v29, %v1199_v13  ;;  %v1208_v18 = vadd.f32 %v1206_v29, %v1200_v14  ;;  %v1209_v19 = vadd.f32 %v1206_v29, %v1201_v15  ;;  %v1210_v20 = vadd.f32 %v1206_v29, %v1202_v16 }
 0x64e   :  { %vm1211_vm7 = vcmp.ge.f32.partialorder %v1207_v17, 0.0  ;;  %vm1212_vm8 = vcmp.ge.f32.partialorder %v1208_v18, 0.0  ;;  %vm1213_vm9 = vcmp.ge.f32.partialorder %v1209_v19, 0.0  ;;  %vm1214_vm10 = vcmp.ge.f32.partialorder %v1210_v20, 0.0 }
 0x64f   :  { %v1215_v21 = vmul.f32 0.01, %v1207_v17  ;;  %v1216_v38 = vmul.f32 0.01, %v1208_v18  ;;  %v1217_v22 = vmul.f32 0.01, %v1209_v19 }
 0x650   :  { %v1218_v23 = vmul.f32 0.01, %v1210_v20 }
 0x651   :  { %v1219_v28 = vsel %vm1211_vm7, %v1207_v17, %v1215_v21  ;;  %v1220_v7 = vsel %vm1212_vm8, %v1208_v18, %v1216_v38  ;;  %v1221_v25 = vsel %vm1213_vm9, %v1209_v19, %v1217_v22 }
 0x652   :  { %v1222_v24 = vsel %vm1214_vm10, %v1210_v20, %v1218_v23  ;;  %1223 = vst [vmem:[#allocation9] sm:$0xff] %v1219_v28  ;;  %1224 = vst [vmem:[#allocation9 + $0x8] sm:$0xff] %v1220_v7 }
 0x653   :  { %1225 = vst [vmem:[#allocation9 + $0x10] sm:$0xff] %v1221_v25  ;;  %1226 = vst [vmem:[#allocation9 + $0x18] sm:$0xff] %v1222_v24 }
 0x654   :  { %2037 = shalt.err (!%p2034_p6)
}
 0x655   :  { %s2038_s17 = scalar_lea.hbm %s2339_s9, 512 }
 0x656   :  { %p2039_p7 = scmp.ne.s32.totalorder %s2339_s9, %s2038_s17  ;;  %p2042_p8 = scmp.lt.u32.totalorder %s2038_s17, %s2339_s9 }
 0x658   :  { %p2044_p9 = pnand %p2042_p8, %p2039_p7 }
 0x65a   :  { %2047 = shalt.err (!%p2044_p9)
}
 0x65b   :  { %1238 = dma.vmem_to_hbm [thread:$0]  %s1233_s6, 512, %s2339_s9, [#allocation6], %s2055_s19, %s2055_s19, %s2056_s20  }
 0x65c   :  { %2052 = dma.done.wait [#allocation6], 512  }
 0x65d   :  { %2053 = vsyncadd [#allocation6], 4294966784 }
 0x65e   :  { %1242 = vsyncpa [#allocation5], 1 }
 0x65f   :  { %1243 = vsyncpa [#allocation8], 1 }
 0x660   :  { %1244 = vsyncpa [#allocation6], 1 }

</bundles_post_ra>
